<compile_context>
chip_gen: v7x
topology: tpu7x:2x2x1
jax: 0.10.0
libtpu: 0.0.40
codegen_flags: <defaults>
</compile_context>

<pallas_src>
import functools

import jax
import jax.numpy as jnp
from jax.experimental import pallas as pl
from jax.experimental.pallas import tpu as pltpu


def _round_up(x, m):
    return ((x + m - 1) // m) * m


def _rnn_fc_kernel(x_ref, wih_ref, whh_ref, wlin_ref, blin_ref, out_ref):
    """Batch-minor Elman recurrence with in-kernel one-hot projection + FC.

    x_ref   : (T, BT)    sorted, clipped int32 indices (batch on lane axis)
    wih_ref : (H, V)     input weights with (b_ih + b_hh) folded in
    whh_ref : (H, H)     hidden->hidden weights (original, un-transposed)
    wlin_ref: (O_pad, H) final linear weights (rows padded to sublane mult.)
    blin_ref: (O_pad, 1) final linear bias
    out_ref : (O_pad, BT)
    """
    T, BT = x_ref.shape
    H, V = wih_ref.shape
    wih = wih_ref[...]
    whh = whh_ref[...]

    def proj(t):
        # One-hot built in-kernel: (V, BT) compare against iota, then a tiny
        # (H, V) x (V, BT) MXU dot. Bias is already folded into wih.
        xt = x_ref[pl.ds(t, 1), :]                                    # (1, BT)
        iota = jax.lax.broadcasted_iota(jnp.int32, (V, BT), 0)        # (V, BT)
        oh = (iota == xt).astype(jnp.float32)
        return jnp.dot(wih, oh, preferred_element_type=jnp.float32)   # (H, BT)

    # h0 == 0, so the first step has no hidden-to-hidden term.
    h = jnp.tanh(proj(0))
    # T is small and static -> unroll the true sequential dependence; each step
    # is one (H,H)x(H,BT) MXU op + the tiny projection dot + VPU add + EUP tanh.
    for t in range(1, T):
        h = jnp.tanh(
            proj(t) + jnp.dot(whh, h, preferred_element_type=jnp.float32)
        )

    out_ref[...] = (
        jnp.dot(wlin_ref[...], h, preferred_element_type=jnp.float32)
        + blin_ref[...]
    )


def init_params(key, max_possible_load, hidden_size, max_threshold):
    """Deterministic PyTorch-style init: U(-1/sqrt(H), 1/sqrt(H))."""
    V = max_possible_load + 1
    H = hidden_size
    O = max_threshold + 1
    ks = jax.random.split(key, 6)
    s = 1.0 / float(H) ** 0.5
    return {
        "w_ih": jax.random.uniform(ks[0], (H, V), jnp.float32, -s, s),
        "w_hh": jax.random.uniform(ks[1], (H, H), jnp.float32, -s, s),
        "b_ih": jax.random.uniform(ks[2], (H,), jnp.float32, -s, s),
        "b_hh": jax.random.uniform(ks[3], (H,), jnp.float32, -s, s),
        "w_lin": jax.random.uniform(ks[4], (O, H), jnp.float32, -s, s),
        "b_lin": jax.random.uniform(ks[5], (O,), jnp.float32, -s, s),
    }


def prepare_params(params):
    """One-time bias fold / sublane padding (cache across calls)."""
    H, V = params["w_ih"].shape
    O = params["w_lin"].shape[0]
    O_pad = _round_up(O, 8)
    # One-hot columns sum to 1, so  W_ih @ oh + b  ==  (W_ih + b*1^T) @ oh.
    bias = (params["b_ih"] + params["b_hh"]).astype(jnp.float32)
    wih_fold = params["w_ih"].astype(jnp.float32) + bias[:, None]      # (H, V)
    wlin_pad = (
        jnp.zeros((O_pad, H), jnp.float32).at[:O, :].set(params["w_lin"])
    )
    blin_pad = (
        jnp.zeros((O_pad, 1), jnp.float32).at[:O, 0].set(params["b_lin"])
    )
    return {
        "wih_fold": wih_fold,                                          # (H, V)
        "whh": params["w_hh"].astype(jnp.float32),                     # (H, H)
        "wlin_pad": wlin_pad,                                          # (O_pad, H)
        "blin_pad": blin_pad,                                          # (O_pad, 1)
    }


@functools.partial(jax.jit, static_argnames=("max_possible_load", "out_dim"))
def full_two_thinning_forward(x_int, prepared, max_possible_load, out_dim):
    """clip / sort glue in JAX; one-hot projection, recurrence and FC in Pallas."""
    # Matches torch: minimum(upper clip) -> sort. Also clamp negatives to 0
    # (PyTorch one_hot would raise on them; don't let them wrap silently).
    x = jnp.clip(x_int, 0, max_possible_load)
    x = jnp.sort(x, axis=-1).astype(jnp.int32)                 # (B, T)
    B, T = x.shape
    H, V = prepared["wih_fold"].shape
    O_pad = prepared["wlin_pad"].shape[0]

    # Batch lives on the lane axis -> pad to a multiple of 128. Divisor-aware
    # tiling: cap tiles at 1024 rows but size them so the last tile is not
    # mostly padding (waste <= 128 rows per tile over the 128-aligned size).
    B_128 = _round_up(B, 128)
    BT_CAP = 1024
    G = -(-B_128 // BT_CAP)                 # number of grid steps
    BT = _round_up(-(-B_128 // G), 128)     # rows per tile (multiple of 128)
    B_pad = G * BT

    # Padded columns use index 0: they produce a valid one-hot and harmless
    # garbage rows that are sliced off below.
    x_t = jnp.zeros((T, B_pad), jnp.int32).at[:, :B].set(x.T)

    out = pl.pallas_call(
        _rnn_fc_kernel,
        out_shape=jax.ShapeDtypeStruct((O_pad, B_pad), jnp.float32),
        grid_spec=pltpu.PrefetchScalarGridSpec(
            num_scalar_prefetch=0,
            grid=(G,),
            in_specs=[
                pl.BlockSpec((T, BT), lambda i: (0, i)),       # indices, tiled
                pl.BlockSpec((H, V), lambda i: (0, 0)),        # resident
                pl.BlockSpec((H, H), lambda i: (0, 0)),        # resident
                pl.BlockSpec((O_pad, H), lambda i: (0, 0)),    # resident
                pl.BlockSpec((O_pad, 1), lambda i: (0, 0)),    # resident
            ],
            out_specs=pl.BlockSpec((O_pad, BT), lambda i: (0, i)),  # lane-dense
        ),
        compiler_params=pltpu.CompilerParams(
            dimension_semantics=("parallel",),
        ),
    )(
        x_t,
        prepared["wih_fold"],
        prepared["whh"],
        prepared["wlin_pad"],
        prepared["blin_pad"],
    )

    # (O_pad, B_pad) -> (B, O); the transpose of a tiny (O, B) slab is cheap.
    return out[:out_dim, :B].T


def _reference_forward(x_int, params, max_possible_load):
    """Pure-JAX reference mirroring the PyTorch forward (f32)."""
    x = jnp.minimum(x_int, max_possible_load)
    x = jnp.sort(x, axis=-1)
    oh = jax.nn.one_hot(x, max_possible_load + 1, dtype=jnp.float32)
    B, T, V = oh.shape
    H = params["w_hh"].shape[0]
    h = jnp.zeros((B, H), jnp.float32)
    for t in range(T):
        h = jnp.tanh(
            oh[:, t, :] @ params["w_ih"].T
            + params["b_ih"]
            + h @ params["w_hh"].T
            + params["b_hh"]
        )
    return h @ params["w_lin"].T + params["b_lin"]


if __name__ == "__main__":
    # Small shapes consistent with the module:
    #   n (seq len) = 8, max_possible_load = 15 (V=16), hidden = 32,
    #   max_threshold = 7 (O=8), batch = 2.
    n = 8
    max_possible_load = 15
    max_threshold = 7
    hidden_size = 32
    batch = 2

    key = jax.random.PRNGKey(0)
    k_x, k_p = jax.random.split(key)
    # Integer bin loads, some exceeding max_possible_load so the clip matters.
    x = jax.random.randint(
        k_x, (batch, n), 0, max_possible_load + 5, dtype=jnp.int32
    )
    params = init_params(k_p, max_possible_load, hidden_size, max_threshold)
    prepared = prepare_params(params)

    out = full_two_thinning_forward(
        x, prepared, max_possible_load, max_threshold + 1
    )
    out = jax.block_until_ready(out)

    assert out.shape == (batch, max_threshold + 1), out.shape
    ref = _reference_forward(x, params, max_possible_load)
    assert jnp.allclose(out, ref, atol=1e-4, rtol=1e-4), (out, ref)

    print("KERNEL_OK")
</pallas_src>

<mosaic_0001>
module attributes {stable_mosaic.version = 11 : i64} {
  func.func @_rnn_fc_kernel(%arg0: i32, %arg1: memref<8x128xi32, #tpu.memory_space<vmem>>, %arg2: memref<32x16xf32, #tpu.memory_space<vmem>>, %arg3: memref<32x32xf32, #tpu.memory_space<vmem>>, %arg4: memref<8x32xf32, #tpu.memory_space<vmem>>, %arg5: memref<8x1xf32, #tpu.memory_space<vmem>>, %arg6: memref<8x128xf32, #tpu.memory_space<vmem>>) attributes {dimension_semantics = [#tpu.dimension_semantics<parallel>], iteration_bounds = array<i64: 1>, scalar_prefetch = 0 : i64, scratch_operands = 0 : i64, tpu.core_type = #tpu.core_type<tc>, window_params = [{transform_indices = @transform_0, window_bounds = array<i64: 8, 128>}, {pipeline_mode = #tpu.pipeline_mode<synchronous>, transform_indices = @transform_1, window_bounds = array<i64: 32, 16>}, {pipeline_mode = #tpu.pipeline_mode<synchronous>, transform_indices = @transform_2, window_bounds = array<i64: 32, 32>}, {pipeline_mode = #tpu.pipeline_mode<synchronous>, transform_indices = @transform_3, window_bounds = array<i64: 8, 32>}, {pipeline_mode = #tpu.pipeline_mode<synchronous>, transform_indices = @transform_4, window_bounds = array<i64: 8, 1>}, {transform_indices = @transform_5, window_bounds = array<i64: 8, 128>}]} {
    %c0 = arith.constant 0 : index
    %c0_0 = arith.constant 0 : index
    %0 = vector.load %arg2[%c0, %c0_0] : memref<32x16xf32, #tpu.memory_space<vmem>>, vector<32x16xf32>
    %c0_1 = arith.constant 0 : index
    %c0_2 = arith.constant 0 : index
    %1 = vector.load %arg3[%c0_1, %c0_2] : memref<32x32xf32, #tpu.memory_space<vmem>>, vector<32x32xf32>
    %c0_3 = arith.constant 0 : index
    %c0_4 = arith.constant 0 : index
    %2 = vector.load %arg1[%c0_3, %c0_4] : memref<8x128xi32, #tpu.memory_space<vmem>>, vector<1x128xi32>
    %3 = tpu.iota {dimensions = array<i32: 0>} : vector<16x128xi32>
    %4 = vector.broadcast %2 : vector<1x128xi32> to vector<16x128xi32>
    %5 = arith.cmpi eq, %3, %4 : vector<16x128xi32>
    %6 = arith.extui %5 : vector<16x128xi1> to vector<16x128xi32>
    %7 = arith.sitofp %6 : vector<16x128xi32> to vector<16x128xf32>
    %cst = arith.constant dense<0.000000e+00> : vector<32x128xf32>
    %8 = tpu.matmul %0, %7, %cst {dimension_numbers = #tpu.dot_dimension_numbers<[1], [0], [0], [1], [0, 0, 1, 1], [], []>} : vector<32x16xf32>, vector<16x128xf32>, vector<32x128xf32> -> vector<32x128xf32>
    %9 = math.tanh %8 : vector<32x128xf32>
    %c1 = arith.constant 1 : index
    %c0_5 = arith.constant 0 : index
    %10 = vector.load %arg1[%c1, %c0_5] : memref<8x128xi32, #tpu.memory_space<vmem>>, vector<1x128xi32>
    %11 = tpu.iota {dimensions = array<i32: 0>} : vector<16x128xi32>
    %12 = vector.broadcast %10 : vector<1x128xi32> to vector<16x128xi32>
    %13 = arith.cmpi eq, %11, %12 : vector<16x128xi32>
    %14 = arith.extui %13 : vector<16x128xi1> to vector<16x128xi32>
    %15 = arith.sitofp %14 : vector<16x128xi32> to vector<16x128xf32>
    %cst_6 = arith.constant dense<0.000000e+00> : vector<32x128xf32>
    %16 = tpu.matmul %0, %15, %cst_6 {dimension_numbers = #tpu.dot_dimension_numbers<[1], [0], [0], [1], [0, 0, 1, 1], [], []>} : vector<32x16xf32>, vector<16x128xf32>, vector<32x128xf32> -> vector<32x128xf32>
    %cst_7 = arith.constant dense<0.000000e+00> : vector<32x128xf32>
    %17 = tpu.matmul %1, %9, %cst_7 {dimension_numbers = #tpu.dot_dimension_numbers<[1], [0], [0], [1], [0, 0, 1, 1], [], []>} : vector<32x32xf32>, vector<32x128xf32>, vector<32x128xf32> -> vector<32x128xf32>
    %18 = arith.addf %16, %17 : vector<32x128xf32>
    %19 = math.tanh %18 : vector<32x128xf32>
    %c2 = arith.constant 2 : index
    %c0_8 = arith.constant 0 : index
    %20 = vector.load %arg1[%c2, %c0_8] : memref<8x128xi32, #tpu.memory_space<vmem>>, vector<1x128xi32>
    %21 = tpu.iota {dimensions = array<i32: 0>} : vector<16x128xi32>
    %22 = vector.broadcast %20 : vector<1x128xi32> to vector<16x128xi32>
    %23 = arith.cmpi eq, %21, %22 : vector<16x128xi32>
    %24 = arith.extui %23 : vector<16x128xi1> to vector<16x128xi32>
    %25 = arith.sitofp %24 : vector<16x128xi32> to vector<16x128xf32>
    %cst_9 = arith.constant dense<0.000000e+00> : vector<32x128xf32>
    %26 = tpu.matmul %0, %25, %cst_9 {dimension_numbers = #tpu.dot_dimension_numbers<[1], [0], [0], [1], [0, 0, 1, 1], [], []>} : vector<32x16xf32>, vector<16x128xf32>, vector<32x128xf32> -> vector<32x128xf32>
    %cst_10 = arith.constant dense<0.000000e+00> : vector<32x128xf32>
    %27 = tpu.matmul %1, %19, %cst_10 {dimension_numbers = #tpu.dot_dimension_numbers<[1], [0], [0], [1], [0, 0, 1, 1], [], []>} : vector<32x32xf32>, vector<32x128xf32>, vector<32x128xf32> -> vector<32x128xf32>
    %28 = arith.addf %26, %27 : vector<32x128xf32>
    %29 = math.tanh %28 : vector<32x128xf32>
    %c3 = arith.constant 3 : index
    %c0_11 = arith.constant 0 : index
    %30 = vector.load %arg1[%c3, %c0_11] : memref<8x128xi32, #tpu.memory_space<vmem>>, vector<1x128xi32>
    %31 = tpu.iota {dimensions = array<i32: 0>} : vector<16x128xi32>
    %32 = vector.broadcast %30 : vector<1x128xi32> to vector<16x128xi32>
    %33 = arith.cmpi eq, %31, %32 : vector<16x128xi32>
    %34 = arith.extui %33 : vector<16x128xi1> to vector<16x128xi32>
    %35 = arith.sitofp %34 : vector<16x128xi32> to vector<16x128xf32>
    %cst_12 = arith.constant dense<0.000000e+00> : vector<32x128xf32>
    %36 = tpu.matmul %0, %35, %cst_12 {dimension_numbers = #tpu.dot_dimension_numbers<[1], [0], [0], [1], [0, 0, 1, 1], [], []>} : vector<32x16xf32>, vector<16x128xf32>, vector<32x128xf32> -> vector<32x128xf32>
    %cst_13 = arith.constant dense<0.000000e+00> : vector<32x128xf32>
    %37 = tpu.matmul %1, %29, %cst_13 {dimension_numbers = #tpu.dot_dimension_numbers<[1], [0], [0], [1], [0, 0, 1, 1], [], []>} : vector<32x32xf32>, vector<32x128xf32>, vector<32x128xf32> -> vector<32x128xf32>
    %38 = arith.addf %36, %37 : vector<32x128xf32>
    %39 = math.tanh %38 : vector<32x128xf32>
    %c4 = arith.constant 4 : index
    %c0_14 = arith.constant 0 : index
    %40 = vector.load %arg1[%c4, %c0_14] : memref<8x128xi32, #tpu.memory_space<vmem>>, vector<1x128xi32>
    %41 = tpu.iota {dimensions = array<i32: 0>} : vector<16x128xi32>
    %42 = vector.broadcast %40 : vector<1x128xi32> to vector<16x128xi32>
    %43 = arith.cmpi eq, %41, %42 : vector<16x128xi32>
    %44 = arith.extui %43 : vector<16x128xi1> to vector<16x128xi32>
    %45 = arith.sitofp %44 : vector<16x128xi32> to vector<16x128xf32>
    %cst_15 = arith.constant dense<0.000000e+00> : vector<32x128xf32>
    %46 = tpu.matmul %0, %45, %cst_15 {dimension_numbers = #tpu.dot_dimension_numbers<[1], [0], [0], [1], [0, 0, 1, 1], [], []>} : vector<32x16xf32>, vector<16x128xf32>, vector<32x128xf32> -> vector<32x128xf32>
    %cst_16 = arith.constant dense<0.000000e+00> : vector<32x128xf32>
    %47 = tpu.matmul %1, %39, %cst_16 {dimension_numbers = #tpu.dot_dimension_numbers<[1], [0], [0], [1], [0, 0, 1, 1], [], []>} : vector<32x32xf32>, vector<32x128xf32>, vector<32x128xf32> -> vector<32x128xf32>
    %48 = arith.addf %46, %47 : vector<32x128xf32>
    %49 = math.tanh %48 : vector<32x128xf32>
    %c5 = arith.constant 5 : index
    %c0_17 = arith.constant 0 : index
    %50 = vector.load %arg1[%c5, %c0_17] : memref<8x128xi32, #tpu.memory_space<vmem>>, vector<1x128xi32>
    %51 = tpu.iota {dimensions = array<i32: 0>} : vector<16x128xi32>
    %52 = vector.broadcast %50 : vector<1x128xi32> to vector<16x128xi32>
    %53 = arith.cmpi eq, %51, %52 : vector<16x128xi32>
    %54 = arith.extui %53 : vector<16x128xi1> to vector<16x128xi32>
    %55 = arith.sitofp %54 : vector<16x128xi32> to vector<16x128xf32>
    %cst_18 = arith.constant dense<0.000000e+00> : vector<32x128xf32>
    %56 = tpu.matmul %0, %55, %cst_18 {dimension_numbers = #tpu.dot_dimension_numbers<[1], [0], [0], [1], [0, 0, 1, 1], [], []>} : vector<32x16xf32>, vector<16x128xf32>, vector<32x128xf32> -> vector<32x128xf32>
    %cst_19 = arith.constant dense<0.000000e+00> : vector<32x128xf32>
    %57 = tpu.matmul %1, %49, %cst_19 {dimension_numbers = #tpu.dot_dimension_numbers<[1], [0], [0], [1], [0, 0, 1, 1], [], []>} : vector<32x32xf32>, vector<32x128xf32>, vector<32x128xf32> -> vector<32x128xf32>
    %58 = arith.addf %56, %57 : vector<32x128xf32>
    %59 = math.tanh %58 : vector<32x128xf32>
    %c6 = arith.constant 6 : index
    %c0_20 = arith.constant 0 : index
    %60 = vector.load %arg1[%c6, %c0_20] : memref<8x128xi32, #tpu.memory_space<vmem>>, vector<1x128xi32>
    %61 = tpu.iota {dimensions = array<i32: 0>} : vector<16x128xi32>
    %62 = vector.broadcast %60 : vector<1x128xi32> to vector<16x128xi32>
    %63 = arith.cmpi eq, %61, %62 : vector<16x128xi32>
    %64 = arith.extui %63 : vector<16x128xi1> to vector<16x128xi32>
    %65 = arith.sitofp %64 : vector<16x128xi32> to vector<16x128xf32>
    %cst_21 = arith.constant dense<0.000000e+00> : vector<32x128xf32>
    %66 = tpu.matmul %0, %65, %cst_21 {dimension_numbers = #tpu.dot_dimension_numbers<[1], [0], [0], [1], [0, 0, 1, 1], [], []>} : vector<32x16xf32>, vector<16x128xf32>, vector<32x128xf32> -> vector<32x128xf32>
    %cst_22 = arith.constant dense<0.000000e+00> : vector<32x128xf32>
    %67 = tpu.matmul %1, %59, %cst_22 {dimension_numbers = #tpu.dot_dimension_numbers<[1], [0], [0], [1], [0, 0, 1, 1], [], []>} : vector<32x32xf32>, vector<32x128xf32>, vector<32x128xf32> -> vector<32x128xf32>
    %68 = arith.addf %66, %67 : vector<32x128xf32>
    %69 = math.tanh %68 : vector<32x128xf32>
    %c7 = arith.constant 7 : index
    %c0_23 = arith.constant 0 : index
    %70 = vector.load %arg1[%c7, %c0_23] : memref<8x128xi32, #tpu.memory_space<vmem>>, vector<1x128xi32>
    %71 = tpu.iota {dimensions = array<i32: 0>} : vector<16x128xi32>
    %72 = vector.broadcast %70 : vector<1x128xi32> to vector<16x128xi32>
    %73 = arith.cmpi eq, %71, %72 : vector<16x128xi32>
    %74 = arith.extui %73 : vector<16x128xi1> to vector<16x128xi32>
    %75 = arith.sitofp %74 : vector<16x128xi32> to vector<16x128xf32>
    %cst_24 = arith.constant dense<0.000000e+00> : vector<32x128xf32>
    %76 = tpu.matmul %0, %75, %cst_24 {dimension_numbers = #tpu.dot_dimension_numbers<[1], [0], [0], [1], [0, 0, 1, 1], [], []>} : vector<32x16xf32>, vector<16x128xf32>, vector<32x128xf32> -> vector<32x128xf32>
    %cst_25 = arith.constant dense<0.000000e+00> : vector<32x128xf32>
    %77 = tpu.matmul %1, %69, %cst_25 {dimension_numbers = #tpu.dot_dimension_numbers<[1], [0], [0], [1], [0, 0, 1, 1], [], []>} : vector<32x32xf32>, vector<32x128xf32>, vector<32x128xf32> -> vector<32x128xf32>
    %78 = arith.addf %76, %77 : vector<32x128xf32>
    %79 = math.tanh %78 : vector<32x128xf32>
    %c0_26 = arith.constant 0 : index
    %c0_27 = arith.constant 0 : index
    %80 = vector.load %arg4[%c0_26, %c0_27] : memref<8x32xf32, #tpu.memory_space<vmem>>, vector<8x32xf32>
    %cst_28 = arith.constant dense<0.000000e+00> : vector<8x128xf32>
    %81 = tpu.matmul %80, %79, %cst_28 {dimension_numbers = #tpu.dot_dimension_numbers<[1], [0], [0], [1], [0, 0, 1, 1], [], []>} : vector<8x32xf32>, vector<32x128xf32>, vector<8x128xf32> -> vector<8x128xf32>
    %c0_29 = arith.constant 0 : index
    %c0_30 = arith.constant 0 : index
    %82 = vector.load %arg5[%c0_29, %c0_30] : memref<8x1xf32, #tpu.memory_space<vmem>>, vector<8x1xf32>
    %83 = vector.broadcast %82 : vector<8x1xf32> to vector<8x128xf32>
    %84 = arith.addf %81, %83 : vector<8x128xf32>
    %c0_31 = arith.constant 0 : index
    %c0_32 = arith.constant 0 : index
    %85 = vector.load %arg6[%c0_31, %c0_32] : memref<8x128xf32, #tpu.memory_space<vmem>>, vector<8x128xf32>
    tpu.vector_store %arg6[%c0_31, %c0_32], %84 {strides = array<i32>} : memref<8x128xf32, #tpu.memory_space<vmem>>, vector<8x128xf32>,
    return
  }
  func.func @transform_0(%arg0: i32) -> (i32, i32) {
    %c0_i32 = arith.constant 0 : i32
    %c0_i32_0 = arith.constant 0 : i32
    return %c0_i32, %arg0 : i32, i32
  }
  func.func @transform_1(%arg0: i32) -> (i32, i32) {
    %c0_i32 = arith.constant 0 : i32
    %c0_i32_0 = arith.constant 0 : i32
    %c0_i32_1 = arith.constant 0 : i32
    return %c0_i32, %c0_i32_0 : i32, i32
  }
  func.func @transform_2(%arg0: i32) -> (i32, i32) {
    %c0_i32 = arith.constant 0 : i32
    %c0_i32_0 = arith.constant 0 : i32
    %c0_i32_1 = arith.constant 0 : i32
    return %c0_i32, %c0_i32_0 : i32, i32
  }
  func.func @transform_3(%arg0: i32) -> (i32, i32) {
    %c0_i32 = arith.constant 0 : i32
    %c0_i32_0 = arith.constant 0 : i32
    %c0_i32_1 = arith.constant 0 : i32
    return %c0_i32, %c0_i32_0 : i32, i32
  }
  func.func @transform_4(%arg0: i32) -> (i32, i32) {
    %c0_i32 = arith.constant 0 : i32
    %c0_i32_0 = arith.constant 0 : i32
    %c0_i32_1 = arith.constant 0 : i32
    return %c0_i32, %c0_i32_0 : i32, i32
  }
  func.func @transform_5(%arg0: i32) -> (i32, i32) {
    %c0_i32 = arith.constant 0 : i32
    %c0_i32_0 = arith.constant 0 : i32
    return %c0_i32, %arg0 : i32, i32
  }
}

</mosaic_0001>

<bundles_post_ra>
// kernel: full_two_thinning_forward.1
= control target key start
LH: loop header
LB: loop body
LE: loop exit
PB: predicated region body
PF: predicated region fallthrough
CT: control target
= control target key end

     0   :  { %v29_v0 = vlaneseq  ;;  %vm42_vm0 = vcmask 130048   ;;  %v2128_v5 = vmov 1.0|1.0   ;;  %vm155_vm4 = vcmask 261120   ;;  %s2394_s0 = inlined_call_operand.vmem [shape: s32[8,128], index: 0, kind: input, shape index: {}]   ;;  %s2395_s1 = inlined_call_operand.vmem [shape: f32[32,16], index: 1, kind: input, shape index: {}]   ;;  %s2396_s2 = inlined_call_operand.vmem [shape: f32[32,32], index: 2, kind: input, shape index: {}]   ;;  %s2397_s4 = inlined_call_operand.vmem [shape: f32[8,1], index: 4, kind: input, shape index: {}]   ;;  %s2398_s3 = inlined_call_operand.vmem [shape: f32[8,32], index: 3, kind: input, shape index: {}]   ;;  %s2399_s5 = inlined_call_operand.vmem [shape: f32[8,128], index: 5, kind: output, shape index: {}]  }
   0x1   :  { %v1537_v1 = vld [vmem:[%s2394_s0] ss:$0 sm:$0xff]  ;;  %v2185_v6 = vld [vmem:[%s2395_s1 + $0x8] sm:$0xff]  ;;  %v2190_v7 = vld [vmem:[%s2395_s1 + $0x10] sm:$0xff] }
   0x2   :  { %v2169_v2 = vld [vmem:[%s2395_s1] sm:$0xff]  ;;  %v2171_v3 = vshrl.u32 %v29_v0, 7  ;;  %v2199_v8 = vld [vmem:[%s2395_s1 + $0x18] sm:$0xff]  ;;  %v2220_v21 = vld [vmem:[%s2396_s2 + $0x8] sm:$0xff] }
   0x3   :  { %1751 = vmatprep.mubr.msk.f32.mxu0 %vm42_vm0, %v2169_v2  ;;  %v2206_v9 = vld [vmem:[%s2396_s2] sm:$0xff]  ;;  %v2226_v22 = vld [vmem:[%s2396_s2 + $0x10] sm:$0xff]  ;;  %v2236_v23 = vld [vmem:[%s2396_s2 + $0x18] sm:$0xff] }
   0x4   :  { %v2176_v4 = vadd.s32 8, %v2171_v3  ;;  %vm36_vm1 = vcmp.eq.s32.totalorder %v2171_v3, %v1537_v1  ;;  %1765 = vmatprep.mubr.msk.f32.mxu1 %vm155_vm4, %v2206_v9  ;;  %v1546_v16 = vld [vmem:[%s2394_s0 + $0x1] ss:$0 sm:$0xff]  ;;  %v1559_v30 = vld [vmem:[%s2394_s0 + $0x2] ss:$0 sm:$0xff] }
   0x5   :  { %vm149_vm5 = vcmp.eq.s32.totalorder %v2171_v3, %v1546_v16  ;;  %vm347_vm8 = vcmp.eq.s32.totalorder %v2171_v3, %v1559_v30  ;;  %v1572_v41 = vld [vmem:[%s2394_s0 + $0x3] ss:$0 sm:$0xff]  ;;  %v1585_v52 = vld [vmem:[%s2394_s0 + $0x4] ss:$0 sm:$0xff]  ;;  %v1598_v63 = vld [vmem:[%s2394_s0 + $0x5] ss:$0 sm:$0xff] }
   0x6   :  { %vm37_vm2 = vcmp.eq.s32.totalorder %v2176_v4, %v1537_v1  ;;  %vm150_vm6 = vcmp.eq.s32.totalorder %v2176_v4, %v1546_v16  ;;  %vm348_vm9 = vcmp.eq.s32.totalorder %v2176_v4, %v1559_v30  ;;  %vm532_vm11 = vcmp.eq.s32.totalorder %v2171_v3, %v1572_v41 }
   0x7   :  { %vm1936_vm3 = vmpackc.low %vm37_vm2, %vm36_vm1  ;;  %vm533_vm12 = vcmp.eq.s32.totalorder %v2176_v4, %v1572_v41  ;;  %vm717_vm14 = vcmp.eq.s32.totalorder %v2171_v3, %v1585_v52  ;;  %vm718_vm15 = vcmp.eq.s32.totalorder %v2176_v4, %v1585_v52  ;;  %vm902_vm2 = vcmp.eq.s32.totalorder %v2171_v3, %v1598_v63 }
   0x8   :  { %1937 = vmatprep.subr.msk.bf16.mxu0 %vm1936_vm3, %v2128_v5  ;;  %vm1948_vm7 = vmpackc.low %vm150_vm6, %vm149_vm5 }
   0x9   :  { %1939 = vmatpush3.bf16.msk.msra.mxu0 %vm1936_vm3, %v2128_v5  ;;  %vm1960_vm10 = vmpackc.low %vm348_vm9, %vm347_vm8  ;;  %vm903_vm3 = vcmp.eq.s32.totalorder %v2176_v4, %v1598_v63 }
   0xa   :  { %vm1972_vm13 = vmpackc.low %vm533_vm12, %vm532_vm11  ;;  %vm2130_vm12 = vmmov 0  }
   0xb   :  { %vm1984_vm1 = vmpackc.low %vm718_vm15, %vm717_vm14 }
   0xc   :  { %1752 = vmatmul.mubr.msk.f32.vlgmr.msra.gmra.mrb[0].mxu0 %vm42_vm0, %v2185_v6  ;;  %vm1996_vm5 = vmpackc.low %vm903_vm3, %vm902_vm2 }
   0xd   :  { %1754 = vmatprep.mubr.msk.f32.mxu0 %vm42_vm0, %v2190_v7 }
  0x10   :  { %1755 = vmatmul.mubr.msk.f32.gmra.mrb[2].mxu0 %vm42_vm0, %v2199_v8 }
  0x11   :  { %1789 = vmatprep.mubr.msk.f32.mxu0 %vm155_vm4, %v2206_v9 }
  0xdf   :  { %v1753_v10 = vpop.f32.mrb[0].mxu0 }
  0xe0   :  { %2064 = vtanh.f32 %v1753_v10  ;;  %v121_v11 = vpop.f32.mrb[1].mxu0 }
  0xe1   :  { %2066 = vtanh.f32 %v121_v11 }
  0xe3   :  { %v1756_v12 = vpop.f32.mrb[2].mxu0 }
  0xe4   :  { %2068 = vtanh.f32 %v1756_v12  ;;  %v131_v13 = vpop.f32.mrb[3].mxu0 }
  0xe5   :  { %2070 = vtanh.f32 %v131_v13 }
  0xea   :  { %v2065_v14 = vpop.eup %2064 }
  0xeb   :  { %v2067_v15 = vpop.eup %2066 }
  0xec   :  { %v1940_v17 = vpack.c.bf16 %v2065_v14, %v2067_v15 }
  0xee   :  { %v2069_v18 = vpop.eup %2068  ;;  %1941 = vmatprep.subr.bf16.mxu1 %v1940_v17 }
  0xef   :  { %v2071_v19 = vpop.eup %2070  ;;  %1943 = vmatpush3.bf16.msra.mxu1 %v1940_v17 }
  0xf0   :  { %v1944_v20 = vpack.c.bf16 %v2069_v18, %v2071_v19  ;;  %v1611_v18 = vld [vmem:[%s2394_s0 + $0x6] ss:$0 sm:$0xff] }
  0xf1   :  { %vm1087_vm6 = vcmp.eq.s32.totalorder %v2171_v3, %v1611_v18 }
  0xf2   :  { %1945 = vmatprep.subr.bf16.mxu1 %v1944_v20 }
  0xf3   :  { %1947 = vmatpush3.bf16.msra.mxu1 %v1944_v20 }
  0xf4   :  { %1949 = vmatprep.subr.msk.bf16.mxu1 %vm1948_vm7, %v2128_v5 }
  0xf6   :  { %1766 = vmatmul.mubr.msk.f32.vlgmr.msra.gmra.mrb[0].mxu1 %vm155_vm4, %v2220_v21 }
  0xf7   :  { %1951 = vmatpush3.bf16.msk.msra.mxu1 %vm1948_vm7, %v2128_v5  ;;  %1768 = vmatprep.mubr.msk.f32.mxu1 %vm155_vm4, %v2226_v22  ;;  %vm1088_vm7 = vcmp.eq.s32.totalorder %v2176_v4, %v1611_v18 }
  0xf8   :  { %vm2008_vm8 = vmpackc.low %vm1088_vm7, %vm1087_vm6 }
  0xfa   :  { %1769 = vmatmul.mubr.msk.f32.gmra.mrb[2].mxu1 %vm155_vm4, %v2236_v23 }
  0xfb   :  { %1775 = vmatprep.mubr.msk.f32.mxu1 %vm42_vm0, %v2169_v2 }
  0xfe   :  { %1776 = vmatmul.mubr.msk.f32.vlgmr.msra.gmra.mrb[0].mxu1 %vm42_vm0, %v2185_v6 }
  0xff   :  { %1778 = vmatprep.mubr.msk.f32.mxu1 %vm42_vm0, %v2190_v7 }
 0x102   :  { %1779 = vmatmul.mubr.msk.f32.gmra.mrb[2].mxu1 %vm42_vm0, %v2199_v8 }
 0x103   :  { %1813 = vmatprep.mubr.msk.f32.mxu1 %vm155_vm4, %v2206_v9 }
 0x1d1   :  { %v1777_v24 = vpop.f32.mrb[0].mxu1 }
 0x1d2   :  { %2072 = vtanh.f32 %v1777_v24  ;;  %v319_v25 = vpop.f32.mrb[1].mxu1 }
 0x1d3   :  { %2074 = vtanh.f32 %v319_v25 }
 0x1d5   :  { %v1780_v26 = vpop.f32.mrb[2].mxu1 }
 0x1d6   :  { %2076 = vtanh.f32 %v1780_v26  ;;  %v329_v27 = vpop.f32.mrb[3].mxu1 }
 0x1d7   :  { %2078 = vtanh.f32 %v329_v27 }
 0x1dc   :  { %v2073_v28 = vpop.eup %2072 }
 0x1dd   :  { %v2075_v29 = vpop.eup %2074 }
 0x1de   :  { %v1952_v31 = vpack.c.bf16 %v2073_v28, %v2075_v29 }
 0x1e0   :  { %v2077_v32 = vpop.eup %2076  ;;  %1953 = vmatprep.subr.bf16.mxu0 %v1952_v31 }
 0x1e1   :  { %v2079_v33 = vpop.eup %2078  ;;  %1955 = vmatpush3.bf16.msra.mxu0 %v1952_v31  ;;  %v1624_v31 = vld [vmem:[%s2394_s0 + $0x7] ss:$0 sm:$0xff] }
 0x1e2   :  { %v1956_v34 = vpack.c.bf16 %v2077_v32, %v2079_v33  ;;  %vm1272_vm9 = vcmp.eq.s32.totalorder %v2171_v3, %v1624_v31  ;;  %v2129_v3 = vmov 0.0|0.0  }
 0x1e4   :  { %1957 = vmatprep.subr.bf16.mxu0 %v1956_v34 }
 0x1e5   :  { %1959 = vmatpush3.bf16.msra.mxu0 %v1956_v34 }
 0x1e6   :  { %1961 = vmatprep.subr.msk.bf16.mxu0 %vm1960_vm10, %v2128_v5 }
 0x1e8   :  { %1790 = vmatmul.mubr.msk.f32.vlgmr.msra.gmra.mrb[4].mxu0 %vm155_vm4, %v2220_v21 }
 0x1e9   :  { %1963 = vmatpush3.bf16.msk.msra.mxu0 %vm1960_vm10, %v2128_v5  ;;  %1792 = vmatprep.mubr.msk.f32.mxu0 %vm155_vm4, %v2226_v22  ;;  %vm1273_vm10 = vcmp.eq.s32.totalorder %v2176_v4, %v1624_v31  ;;  %v2131_v4 = vmov 0.0  }
 0x1ea   :  { %vm2020_vm11 = vmpackc.low %vm1273_vm10, %vm1272_vm9 }
 0x1ec   :  { %1793 = vmatmul.mubr.msk.f32.gmra.mrb[6].mxu0 %vm155_vm4, %v2236_v23 }
 0x1ed   :  { %1799 = vmatprep.mubr.msk.f32.mxu0 %vm42_vm0, %v2169_v2 }
 0x1f0   :  { %1800 = vmatmul.mubr.msk.f32.vlgmr.msra.gmra.mrb[4].mxu0 %vm42_vm0, %v2185_v6 }
 0x1f1   :  { %1802 = vmatprep.mubr.msk.f32.mxu0 %vm42_vm0, %v2190_v7 }
 0x1f4   :  { %1803 = vmatmul.mubr.msk.f32.gmra.mrb[6].mxu0 %vm42_vm0, %v2199_v8 }
 0x1f5   :  { %1837 = vmatprep.mubr.msk.f32.mxu0 %vm155_vm4, %v2206_v9 }
 0x2c3   :  { %v1801_v35 = vpop.f32.mrb[4].mxu0 }
 0x2c4   :  { %2080 = vtanh.f32 %v1801_v35  ;;  %v504_v36 = vpop.f32.mrb[5].mxu0 }
 0x2c5   :  { %2082 = vtanh.f32 %v504_v36 }
 0x2c7   :  { %v1804_v37 = vpop.f32.mrb[6].mxu0 }
 0x2c8   :  { %2084 = vtanh.f32 %v1804_v37  ;;  %v514_v38 = vpop.f32.mrb[7].mxu0 }
 0x2c9   :  { %2086 = vtanh.f32 %v514_v38 }
 0x2ce   :  { %v2081_v39 = vpop.eup %2080 }
 0x2cf   :  { %v2083_v40 = vpop.eup %2082 }
 0x2d0   :  { %v1964_v42 = vpack.c.bf16 %v2081_v39, %v2083_v40  ;;  %v1452_v40 = vld [vmem:[%s2398_s3] sm:$0xff] }
 0x2d2   :  { %v2085_v43 = vpop.eup %2084  ;;  %1965 = vmatprep.subr.bf16.mxu1 %v1964_v42 }
 0x2d3   :  { %v2087_v44 = vpop.eup %2086  ;;  %1967 = vmatpush3.bf16.msra.mxu1 %v1964_v42 }
 0x2d4   :  { %v1968_v45 = vpack.c.bf16 %v2085_v43, %v2087_v44 }
 0x2d6   :  { %1969 = vmatprep.subr.bf16.mxu1 %v1968_v45 }
 0x2d7   :  { %1971 = vmatpush3.bf16.msra.mxu1 %v1968_v45 }
 0x2d8   :  { %1973 = vmatprep.subr.msk.bf16.mxu1 %vm1972_vm13, %v2128_v5 }
 0x2da   :  { %1814 = vmatmul.mubr.msk.f32.vlgmr.msra.gmra.mrb[4].mxu1 %vm155_vm4, %v2220_v21 }
 0x2db   :  { %1975 = vmatpush3.bf16.msk.msra.mxu1 %vm1972_vm13, %v2128_v5  ;;  %1816 = vmatprep.mubr.msk.f32.mxu1 %vm155_vm4, %v2226_v22 }
 0x2de   :  { %1817 = vmatmul.mubr.msk.f32.gmra.mrb[6].mxu1 %vm155_vm4, %v2236_v23 }
 0x2df   :  { %1823 = vmatprep.mubr.msk.f32.mxu1 %vm42_vm0, %v2169_v2 }
 0x2e2   :  { %1824 = vmatmul.mubr.msk.f32.vlgmr.msra.gmra.mrb[4].mxu1 %vm42_vm0, %v2185_v6 }
 0x2e3   :  { %1826 = vmatprep.mubr.msk.f32.mxu1 %vm42_vm0, %v2190_v7 }
 0x2e6   :  { %1827 = vmatmul.mubr.msk.f32.gmra.mrb[6].mxu1 %vm42_vm0, %v2199_v8 }
 0x2e7   :  { %1861 = vmatprep.mubr.msk.f32.mxu1 %vm155_vm4, %v2206_v9 }
 0x3b5   :  { %v1825_v46 = vpop.f32.mrb[4].mxu1 }
 0x3b6   :  { %2088 = vtanh.f32 %v1825_v46  ;;  %v689_v47 = vpop.f32.mrb[5].mxu1 }
 0x3b7   :  { %2090 = vtanh.f32 %v689_v47 }
 0x3b9   :  { %v1828_v48 = vpop.f32.mrb[6].mxu1 }
 0x3ba   :  { %2092 = vtanh.f32 %v1828_v48  ;;  %v699_v49 = vpop.f32.mrb[7].mxu1 }
 0x3bb   :  { %2094 = vtanh.f32 %v699_v49 }
 0x3c0   :  { %v2089_v50 = vpop.eup %2088 }
 0x3c1   :  { %v2091_v51 = vpop.eup %2090 }
 0x3c2   :  { %v1976_v53 = vpack.c.bf16 %v2089_v50, %v2091_v51 }
 0x3c4   :  { %v2093_v54 = vpop.eup %2092  ;;  %1977 = vmatprep.subr.bf16.mxu0 %v1976_v53 }
 0x3c5   :  { %v2095_v55 = vpop.eup %2094  ;;  %1979 = vmatpush3.bf16.msra.mxu0 %v1976_v53 }
 0x3c6   :  { %v1980_v56 = vpack.c.bf16 %v2093_v54, %v2095_v55 }
 0x3c8   :  { %1981 = vmatprep.subr.bf16.mxu0 %v1980_v56 }
 0x3c9   :  { %1983 = vmatpush3.bf16.msra.mxu0 %v1980_v56 }
 0x3ca   :  { %1985 = vmatprep.subr.msk.bf16.mxu0 %vm1984_vm1, %v2128_v5 }
 0x3cc   :  { %1838 = vmatmul.mubr.msk.f32.vlgmr.msra.gmra.mrb[8].mxu0 %vm155_vm4, %v2220_v21 }
 0x3cd   :  { %1987 = vmatpush3.bf16.msk.msra.mxu0 %vm1984_vm1, %v2128_v5  ;;  %1840 = vmatprep.mubr.msk.f32.mxu0 %vm155_vm4, %v2226_v22 }
 0x3d0   :  { %1841 = vmatmul.mubr.msk.f32.gmra.mrb[10].mxu0 %vm155_vm4, %v2236_v23 }
 0x3d1   :  { %1847 = vmatprep.mubr.msk.f32.mxu0 %vm42_vm0, %v2169_v2 }
 0x3d4   :  { %1848 = vmatmul.mubr.msk.f32.vlgmr.msra.gmra.mrb[8].mxu0 %vm42_vm0, %v2185_v6 }
 0x3d5   :  { %1850 = vmatprep.mubr.msk.f32.mxu0 %vm42_vm0, %v2190_v7 }
 0x3d8   :  { %1851 = vmatmul.mubr.msk.f32.gmra.mrb[10].mxu0 %vm42_vm0, %v2199_v8 }
 0x3d9   :  { %1885 = vmatprep.mubr.msk.f32.mxu0 %vm155_vm4, %v2206_v9 }
 0x4a7   :  { %v1849_v57 = vpop.f32.mrb[8].mxu0 }
 0x4a8   :  { %2096 = vtanh.f32 %v1849_v57  ;;  %v874_v58 = vpop.f32.mrb[9].mxu0 }
 0x4a9   :  { %2098 = vtanh.f32 %v874_v58 }
 0x4ab   :  { %v1852_v59 = vpop.f32.mrb[10].mxu0 }
 0x4ac   :  { %2100 = vtanh.f32 %v1852_v59  ;;  %v884_v60 = vpop.f32.mrb[11].mxu0 }
 0x4ad   :  { %2102 = vtanh.f32 %v884_v60 }
 0x4b2   :  { %v2097_v61 = vpop.eup %2096 }
 0x4b3   :  { %v2099_v62 = vpop.eup %2098 }
 0x4b4   :  { %v1988_v0 = vpack.c.bf16 %v2097_v61, %v2099_v62 }
 0x4b6   :  { %v2101_v1 = vpop.eup %2100  ;;  %1989 = vmatprep.subr.bf16.mxu1 %v1988_v0 }
 0x4b7   :  { %v2103_v10 = vpop.eup %2102  ;;  %1991 = vmatpush3.bf16.msra.mxu1 %v1988_v0 }
 0x4b8   :  { %v1992_v11 = vpack.c.bf16 %v2101_v1, %v2103_v10 }
 0x4ba   :  { %1993 = vmatprep.subr.bf16.mxu1 %v1992_v11 }
 0x4bb   :  { %1995 = vmatpush3.bf16.msra.mxu1 %v1992_v11 }
 0x4bc   :  { %1997 = vmatprep.subr.msk.bf16.mxu1 %vm1996_vm5, %v2128_v5 }
 0x4be   :  { %1862 = vmatmul.mubr.msk.f32.vlgmr.msra.gmra.mrb[8].mxu1 %vm155_vm4, %v2220_v21 }
 0x4bf   :  { %1999 = vmatpush3.bf16.msk.msra.mxu1 %vm1996_vm5, %v2128_v5  ;;  %1864 = vmatprep.mubr.msk.f32.mxu1 %vm155_vm4, %v2226_v22 }
 0x4c2   :  { %1865 = vmatmul.mubr.msk.f32.gmra.mrb[10].mxu1 %vm155_vm4, %v2236_v23 }
 0x4c3   :  { %1871 = vmatprep.mubr.msk.f32.mxu1 %vm42_vm0, %v2169_v2 }
 0x4c6   :  { %1872 = vmatmul.mubr.msk.f32.vlgmr.msra.gmra.mrb[8].mxu1 %vm42_vm0, %v2185_v6 }
 0x4c7   :  { %1874 = vmatprep.mubr.msk.f32.mxu1 %vm42_vm0, %v2190_v7 }
 0x4ca   :  { %1875 = vmatmul.mubr.msk.f32.gmra.mrb[10].mxu1 %vm42_vm0, %v2199_v8 }
 0x4cb   :  { %1909 = vmatprep.mubr.msk.f32.mxu1 %vm155_vm4, %v2206_v9 }
 0x599   :  { %v1873_v12 = vpop.f32.mrb[8].mxu1 }
 0x59a   :  { %2104 = vtanh.f32 %v1873_v12  ;;  %v1059_v13 = vpop.f32.mrb[9].mxu1 }
 0x59b   :  { %2106 = vtanh.f32 %v1059_v13 }
 0x59d   :  { %v1876_v14 = vpop.f32.mrb[10].mxu1 }
 0x59e   :  { %2108 = vtanh.f32 %v1876_v14  ;;  %v1069_v15 = vpop.f32.mrb[11].mxu1 }
 0x59f   :  { %2110 = vtanh.f32 %v1069_v15 }
 0x5a4   :  { %v2105_v16 = vpop.eup %2104 }
 0x5a5   :  { %v2107_v17 = vpop.eup %2106 }
 0x5a6   :  { %v2000_v19 = vpack.c.bf16 %v2105_v16, %v2107_v17 }
 0x5a8   :  { %v2109_v20 = vpop.eup %2108  ;;  %2001 = vmatprep.subr.bf16.mxu0 %v2000_v19 }
 0x5a9   :  { %v2111_v9 = vpop.eup %2110  ;;  %2003 = vmatpush3.bf16.msra.mxu0 %v2000_v19 }
 0x5aa   :  { %v2004_v24 = vpack.c.bf16 %v2109_v20, %v2111_v9 }
 0x5ac   :  { %2005 = vmatprep.subr.bf16.mxu0 %v2004_v24 }
 0x5ad   :  { %2007 = vmatpush3.bf16.msra.mxu0 %v2004_v24 }
 0x5ae   :  { %2009 = vmatprep.subr.msk.bf16.mxu0 %vm2008_vm8, %v2128_v5 }
 0x5b0   :  { %1886 = vmatmul.mubr.msk.f32.vlgmr.msra.gmra.mrb[12].mxu0 %vm155_vm4, %v2220_v21 }
 0x5b1   :  { %2011 = vmatpush3.bf16.msk.msra.mxu0 %vm2008_vm8, %v2128_v5  ;;  %1888 = vmatprep.mubr.msk.f32.mxu0 %vm155_vm4, %v2226_v22 }
 0x5b2   :  { %2024 = vmatprep.subr.bf16.mxu0 %v2129_v3 }
 0x5b4   :  { %1889 = vmatmul.mubr.msk.f32.gmra.mrb[14].mxu0 %vm155_vm4, %v2236_v23 }
 0x5b5   :  { %1895 = vmatprep.mubr.msk.f32.mxu0 %vm42_vm0, %v2169_v2 }
 0x5b8   :  { %1896 = vmatmul.mubr.msk.f32.vlgmr.msra.gmra.mrb[12].mxu0 %vm42_vm0, %v2185_v6 }
 0x5b9   :  { %1898 = vmatprep.mubr.msk.f32.mxu0 %vm42_vm0, %v2190_v7 }
 0x5bc   :  { %1899 = vmatmul.mubr.msk.f32.gmra.mrb[14].mxu0 %vm42_vm0, %v2199_v8 }
 0x5bd   :  { %1933 = vmatprep.mubr.msk.f32.mxu0 %vm2130_vm12, %v2131_v4 }
 0x68b   :  { %v1897_v25 = vpop.f32.mrb[12].mxu0 }
 0x68c   :  { %2112 = vtanh.f32 %v1897_v25  ;;  %v1244_v26 = vpop.f32.mrb[13].mxu0 }
 0x68d   :  { %2114 = vtanh.f32 %v1244_v26 }
 0x68f   :  { %v1900_v27 = vpop.f32.mrb[14].mxu0 }
 0x690   :  { %2116 = vtanh.f32 %v1900_v27  ;;  %v1254_v28 = vpop.f32.mrb[15].mxu0 }
 0x691   :  { %2118 = vtanh.f32 %v1254_v28 }
 0x696   :  { %v2113_v29 = vpop.eup %2112 }
 0x697   :  { %v2115_v30 = vpop.eup %2114 }
 0x698   :  { %v2012_v32 = vpack.c.bf16 %v2113_v29, %v2115_v30 }
 0x69a   :  { %v2117_v33 = vpop.eup %2116  ;;  %2013 = vmatprep.subr.bf16.mxu1 %v2012_v32 }
 0x69b   :  { %v2119_v34 = vpop.eup %2118  ;;  %2015 = vmatpush3.bf16.msra.mxu1 %v2012_v32 }
 0x69c   :  { %v2016_v35 = vpack.c.bf16 %v2117_v33, %v2119_v34 }
 0x69e   :  { %2017 = vmatprep.subr.bf16.mxu1 %v2016_v35 }
 0x69f   :  { %2019 = vmatpush3.bf16.msra.mxu1 %v2016_v35 }
 0x6a0   :  { %2021 = vmatprep.subr.msk.bf16.mxu1 %vm2020_vm11, %v2128_v5 }
 0x6a2   :  { %1910 = vmatmul.mubr.msk.f32.vlgmr.msra.gmra.mrb[12].mxu1 %vm155_vm4, %v2220_v21 }
 0x6a3   :  { %2023 = vmatpush3.bf16.msk.msra.mxu1 %vm2020_vm11, %v2128_v5  ;;  %1912 = vmatprep.mubr.msk.f32.mxu1 %vm155_vm4, %v2226_v22  ;;  %v2132_v5 = vmov 0  }
 0x6a4   :  { %2063 = vset.pattern.permute.xlu0 %v2132_v5 }
 0x6a6   :  { %1913 = vmatmul.mubr.msk.f32.gmra.mrb[14].mxu1 %vm155_vm4, %v2236_v23 }
 0x6a7   :  { %1919 = vmatprep.mubr.msk.f32.mxu1 %vm42_vm0, %v2169_v2  ;;  %v1453_v2 = vld [vmem:[%s2397_s4] sm:$0xff] }
 0x6a8   :  { %1456 = vperm.xlu0 %2063, %v1453_v2  }
 0x6aa   :  { %1920 = vmatmul.mubr.msk.f32.vlgmr.msra.gmra.mrb[12].mxu1 %vm42_vm0, %v2185_v6 }
 0x6ab   :  { %1922 = vmatprep.mubr.msk.f32.mxu1 %vm42_vm0, %v2190_v7 }
 0x6ae   :  { %1923 = vmatmul.mubr.msk.f32.gmra.mrb[14].mxu1 %vm42_vm0, %v2199_v8 }
 0x727   :  { %v1457_v41 = vpop.permute.xlu0 %1456 }
 0x77d   :  { %v1921_v21 = vpop.f32.mrb[12].mxu1 }
 0x77e   :  { %2120 = vtanh.f32 %v1921_v21  ;;  %v1429_v6 = vpop.f32.mrb[13].mxu1 }
 0x77f   :  { %2122 = vtanh.f32 %v1429_v6 }
 0x781   :  { %v1924_v7 = vpop.f32.mrb[14].mxu1 }
 0x782   :  { %2124 = vtanh.f32 %v1924_v7  ;;  %v1439_v22 = vpop.f32.mrb[15].mxu1 }
 0x783   :  { %2126 = vtanh.f32 %v1439_v22 }
 0x788   :  { %v2121_v8 = vpop.eup %2120 }
 0x789   :  { %v2123_v23 = vpop.eup %2122 }
 0x78a   :  { %v2025_v36 = vpack.c.bf16 %v2121_v8, %v2123_v23 }
 0x78c   :  { %v2125_v37 = vpop.eup %2124  ;;  %2026 = vmatpush3.bf16.msra.mxu0 %v2025_v36 }
 0x78d   :  { %v2127_v38 = vpop.eup %2126  ;;  %2027 = vmatprep.subr.bf16.mxu0 %v2129_v3 }
 0x78e   :  { %v2028_v39 = vpack.c.bf16 %v2125_v37, %v2127_v38 }
 0x790   :  { %2029 = vmatpush3.bf16.msra.mxu0 %v2028_v39 }
 0x793   :  { %1934 = vmatmul.mubr.msk.f32.vlgmr.msra.gmra.mrb[16].mxu0 %vm155_vm4, %v1452_v40 }
 0x866   :  { %v1528_v42 = vpop.f32.mrb[16].mxu0 }
 0x867   :  { %v1529_v43 = vadd.f32 %v1528_v42, %v1457_v41  ;;  %v1935_v44 = vpop.f32.mrb[17].mxu0 }
 0x869   :  { %1532 = vst [vmem:[%s2399_s5] sm:$0xff] %v1529_v43 }

</bundles_post_ra>
